<compile_context>
chip_gen: v7x
topology: tpu7x:2x2x1
jax: 0.10.0
libtpu: 0.0.40
codegen_flags: <defaults>
</compile_context>

<pallas_src>
import math

import jax
import jax.numpy as jnp
from jax.experimental import pallas as pl
from jax.experimental.pallas import tpu as pltpu


# --------------------------------------------------------------------------- #
# Helpers                                                                      #
# --------------------------------------------------------------------------- #
def _round_up(x, m):
    return ((x + m - 1) // m) * m


def _pick_tile(dim_p, max_tile, min_tiles=1):
    """Largest multiple of 128 that divides dim_p (a multiple of 128), is <= max_tile,
    and — when possible — leaves at least `min_tiles` grid steps along this axis."""
    m = dim_p // 128
    candidates = [d * 128 for d in range(1, m + 1) if m % d == 0 and d * 128 <= max_tile]
    if not candidates:
        candidates = [128]
    preferred = [t for t in candidates if dim_p // t >= min_tiles]
    return max(preferred or candidates)


# --------------------------------------------------------------------------- #
# Kernel                                                                       #
# --------------------------------------------------------------------------- #
def _make_kernel(use_scratch_acc, compute_dtype):
    def kernel(x_ref, wmu_ref, wsp_ref, epsw_ref, bmu_ref, bsp_ref, epsb_ref,
               o_ref, *scratch):
        acc_ref = scratch[0] if use_scratch_acc else o_ref

        k = pl.program_id(1)              # in_f (K) reduction axis, last / "arbitrary"
        num_k = pl.num_programs(1)

        @pl.when(k == 0)
        def _init():
            acc_ref[...] = jnp.zeros_like(acc_ref)

        # ---- reparameterized weight tile (already transposed to (tk, tn)) ----
        #   W = mu + softplus(spsigma) * eps       (streams arrive bf16, combine in f32)
        wmu = wmu_ref[...].astype(jnp.float32)
        wsp = wsp_ref[...].astype(jnp.float32)
        eps = epsw_ref[...].astype(jnp.float32)
        w = (wmu + jax.nn.softplus(wsp) * eps).astype(compute_dtype)      # (tk, tn)

        x = x_ref[...].astype(compute_dtype)                              # (tb, tk)

        # Plain (tb,tk) @ (tk,tn) — no transpose needed.
        acc_ref[...] += jnp.dot(x, w, preferred_element_type=jnp.float32)

        # ---- finalize once per output tile: reparameterized bias + store ----
        @pl.when(k == num_k - 1)
        def _finalize():
            b = (bmu_ref[...].astype(jnp.float32)
                 + jax.nn.softplus(bsp_ref[...].astype(jnp.float32))
                 * epsb_ref[...].astype(jnp.float32))                     # (1, tn)
            o_ref[...] = (acc_ref[...] + b).astype(o_ref.dtype)

    return kernel


# --------------------------------------------------------------------------- #
# Wrapper                                                                      #
# --------------------------------------------------------------------------- #
def stochastic_linear(x, weight_mu, weight_spsigma, bias_mu, bias_spsigma,
                      *, eps_w=None, eps_b=None, seed=0,
                      block_n=512, block_k=1024, use_bf16=True,
                      vmem_limit_bytes=None):
    """y = x @ (mu_W + softplus(sp_W) * eps_W).T + (mu_b + softplus(sp_b) * eps_b).

    x: (B, in_f); weight_*: (out_f, in_f); bias_*: (out_f,).
    If eps_w / eps_b are None, standard-normal noise is sampled in the wrapper from
    jax.random.PRNGKey(seed); otherwise they must be (out_f, in_f) and (out_f,) arrays.
    """
    assert block_n >= 128 and block_k >= 128
    B, in_f = x.shape
    out_f, in_f2 = weight_mu.shape
    assert in_f == in_f2

    if (eps_w is None) != (eps_b is None):
        raise ValueError("eps_w and eps_b must both be given or both be None")
    if eps_w is None:
        # TODO(synk): on real TPU hardware this noise stream could be generated inside
        # the kernel with the hardware PRNG (pltpu.prng_seed / prng_random_bits) to
        # remove a weight-sized HBM read; kept wrapper-side for portability
        # (interpret / CPU lowering has no prng_seed rule).
        kw, kb = jax.random.split(jax.random.PRNGKey(seed))
        eps_w = jax.random.normal(kw, (out_f, in_f), dtype=jnp.float32)
        eps_b = jax.random.normal(kb, (out_f,), dtype=jnp.float32)

    stream_dtype = jnp.bfloat16 if use_bf16 else jnp.float32
    compute_dtype = jnp.bfloat16 if use_bf16 else jnp.float32

    # ---- pad only to the hardware grain (never to the tile size) ----
    sub = 16 if use_bf16 else 8                 # bf16 packs 16 rows / sublane group
    tb = _round_up(max(B, sub), sub)
    in_p = _round_up(in_f, 128)
    out_p = _round_up(out_f, 128)

    # Tiles must divide the 128-rounded dims; min_tiles=2 on the output (parallel)
    # axis keeps both v7x TensorCores busy when out_p >= 256.
    tn = _pick_tile(out_p, block_n, min_tiles=2 if out_p >= 256 else 1)
    tk = _pick_tile(in_p, block_k)
    num_n = out_p // tn
    num_k = in_p // tk

    def prep_w(a):
        # Transpose to (in_f, out_f): lane dim = out_f, so the kernel matmul is a
        # plain (tb,tk)@(tk,tn) with no per-tile transpose. Fused with the bf16 cast.
        a = a.T
        if a.shape != (in_p, out_p):
            a = jnp.pad(a, ((0, in_p - a.shape[0]), (0, out_p - a.shape[1])))
        return a.astype(stream_dtype)

    def prep_b(a):
        if a.shape[0] != out_p:
            a = jnp.pad(a, (0, out_p - a.shape[0]))
        return a.reshape(1, out_p).astype(jnp.float32)

    xp = x
    if xp.shape != (tb, in_p):
        xp = jnp.pad(xp, ((0, tb - B), (0, in_p - in_f)))

    operands = [
        xp,
        prep_w(weight_mu), prep_w(weight_spsigma), prep_w(eps_w),
        prep_b(bias_mu), prep_b(bias_spsigma), prep_b(eps_b),
    ]
    in_specs = [
        pl.BlockSpec((tb, tk), lambda n, k: (0, k)),   # x: re-read per n (tiny)
        pl.BlockSpec((tk, tn), lambda n, k: (k, n)),   # weight_mu.T tile (read once)
        pl.BlockSpec((tk, tn), lambda n, k: (k, n)),   # weight_spsigma.T tile
        pl.BlockSpec((tk, tn), lambda n, k: (k, n)),   # eps_w.T tile
        pl.BlockSpec((1, tn), lambda n, k: (0, n)),    # bias_mu
        pl.BlockSpec((1, tn), lambda n, k: (0, n)),    # bias_spsigma
        pl.BlockSpec((1, tn), lambda n, k: (0, n)),    # eps_b
    ]

    out_dtype = x.dtype
    use_scratch_acc = jnp.dtype(out_dtype) != jnp.dtype(jnp.float32)
    scratch_shapes = [pltpu.VMEM((tb, tn), jnp.float32)] if use_scratch_acc else []

    w_item = jnp.dtype(stream_dtype).itemsize
    cost = pl.CostEstimate(
        flops=2 * tb * in_p * out_p,
        transcendentals=in_p * out_p + out_p,          # softplus on W tiles + bias
        bytes_accessed=(3 * in_p * out_p * w_item
                        + num_n * tb * in_p * x.dtype.itemsize
                        + tb * out_p * jnp.dtype(out_dtype).itemsize
                        + 3 * out_p * 4),
    )

    cp_kwargs = dict(dimension_semantics=("parallel", "arbitrary"))
    if vmem_limit_bytes is not None:
        cp_kwargs["vmem_limit_bytes"] = int(vmem_limit_bytes)

    y_padded = pl.pallas_call(
        _make_kernel(use_scratch_acc, compute_dtype),
        out_shape=jax.ShapeDtypeStruct((tb, out_p), out_dtype),
        grid=(num_n, num_k),                           # out_f parallel, K reduction last
        in_specs=in_specs,
        out_specs=pl.BlockSpec((tb, tn), lambda n, k: (0, n)),
        scratch_shapes=scratch_shapes,
        compiler_params=pltpu.CompilerParams(**cp_kwargs),
        cost_estimate=cost,
    )(*operands)

    return y_padded[:B, :out_f]


# --------------------------------------------------------------------------- #
# Parameter init (matches StochasticLinear.reset_parameters) + reference       #
# --------------------------------------------------------------------------- #
def init_params(key, in_features, out_features, sigma_init=1.0, dtype=jnp.float32):
    stdv = 1.0 / math.sqrt(in_features)
    k_w, k_b = jax.random.split(key)
    weight_mu = jax.random.uniform(k_w, (out_features, in_features),
                                   minval=-stdv, maxval=stdv, dtype=dtype)
    bias_mu = jax.random.uniform(k_b, (out_features,),
                                 minval=-stdv, maxval=stdv, dtype=dtype)
    sp_fill = math.log(math.exp(sigma_init) - 1.0)
    weight_spsigma = jnp.full((out_features, in_features), sp_fill, dtype=dtype)
    bias_spsigma = jnp.full((out_features,), sp_fill, dtype=dtype)
    return weight_mu, weight_spsigma, bias_mu, bias_spsigma


def _reference(x, wmu, wsp, bmu, bsp, eps_w, eps_b, use_bf16=True):
    """Pure-JAX reference mirroring the kernel's bf16-stream / f32-reparam / f32-acc path."""
    if use_bf16:
        rt = lambda a: a.astype(jnp.bfloat16).astype(jnp.float32)
        wmu, wsp, eps_w = rt(wmu), rt(wsp), rt(eps_w)
    w = wmu + jax.nn.softplus(wsp) * eps_w
    b = bmu + jax.nn.softplus(bsp) * eps_b
    if use_bf16:
        y = jnp.dot(x.astype(jnp.bfloat16), w.T.astype(jnp.bfloat16),
                    preferred_element_type=jnp.float32)
    else:
        y = x @ w.T
    return (y + b[None, :]).astype(x.dtype)


# --------------------------------------------------------------------------- #
# Demo / correctness checks                                                    #
# --------------------------------------------------------------------------- #
if __name__ == "__main__":
    key = jax.random.PRNGKey(0)
    k_p1, k_x1, k_w1, k_b1, k_p2, k_x2, k_w2, k_b2 = jax.random.split(key, 8)

    # -------- Config A: tiny layer (2 x 32 -> 16), single tile ----------------
    B, IN, OUT = 2, 32, 16
    wmu, wsp, bmu, bsp = init_params(k_p1, IN, OUT, sigma_init=1.0)
    x = jax.random.normal(k_x1, (B, IN), dtype=jnp.float32)
    eps_w = jax.random.normal(k_w1, (OUT, IN), dtype=jnp.float32)
    eps_b = jax.random.normal(k_b1, (OUT,), dtype=jnp.float32)

    y = stochastic_linear(x, wmu, wsp, bmu, bsp, eps_w=eps_w, eps_b=eps_b)
    y = jax.block_until_ready(y)
    y_ref = _reference(x, wmu, wsp, bmu, bsp, eps_w, eps_b)
    assert y.shape == (B, OUT)
    assert jnp.allclose(y, y_ref, atol=1e-1, rtol=2e-2), \
        float(jnp.max(jnp.abs(y - y_ref)))

    # -------- Config B: multi-tile grid (out_f parallel x K reduction) --------
    B2, IN2, OUT2 = 4, 384, 256
    wmu2, wsp2, bmu2, bsp2 = init_params(k_p2, IN2, OUT2, sigma_init=1.0)
    x2 = jax.random.normal(k_x2, (B2, IN2), dtype=jnp.float32)
    eps_w2 = jax.random.normal(k_w2, (OUT2, IN2), dtype=jnp.float32)
    eps_b2 = jax.random.normal(k_b2, (OUT2,), dtype=jnp.float32)

    y2 = stochastic_linear(x2, wmu2, wsp2, bmu2, bsp2,
                           eps_w=eps_w2, eps_b=eps_b2,
                           block_n=128, block_k=128)     # grid = (2, 3)
    y2 = jax.block_until_ready(y2)
    y2_ref = _reference(x2, wmu2, wsp2, bmu2, bsp2, eps_w2, eps_b2)
    assert y2.shape == (B2, OUT2)
    assert jnp.allclose(y2, y2_ref, atol=1e-1, rtol=2e-2), \
        float(jnp.max(jnp.abs(y2 - y2_ref)))

    # -------- Config C: wrapper-sampled Gaussian noise (seed-driven) ----------
    y3 = stochastic_linear(x2, wmu2, wsp2, bmu2, bsp2, seed=1234)
    y3 = jax.block_until_ready(y3)
    assert y3.shape == (B2, OUT2)
    assert bool(jnp.all(jnp.isfinite(y3)))
    # Statistical sanity: noise std ~= sqrt(E||x_b||^2 + 1)  (softplus(fill) == 1).
    y_det = x2 @ wmu2.T + bmu2[None, :]
    noise = y3 - y_det
    expected_std = float(jnp.sqrt(jnp.mean(jnp.sum(x2 ** 2, axis=1)) + 1.0))
    obs_std = float(jnp.std(noise))
    assert 0.5 * expected_std < obs_std < 2.0 * expected_std, (obs_std, expected_std)

    print("KERNEL_OK")
</pallas_src>

<mosaic_0001>
module attributes {stable_mosaic.version = 11 : i64} {
  func.func @kernel(%arg0: i32, %arg1: i32, %arg2: memref<16x128xf32, #tpu.memory_space<vmem>>, %arg3: memref<128x128xbf16, #tpu.memory_space<vmem>>, %arg4: memref<128x128xbf16, #tpu.memory_space<vmem>>, %arg5: memref<128x128xbf16, #tpu.memory_space<vmem>>, %arg6: memref<1x128xf32, #tpu.memory_space<vmem>>, %arg7: memref<1x128xf32, #tpu.memory_space<vmem>>, %arg8: memref<1x128xf32, #tpu.memory_space<vmem>>, %arg9: memref<16x128xf32, #tpu.memory_space<vmem>>) attributes {dimension_semantics = [#tpu.dimension_semantics<parallel>, #tpu.dimension_semantics<arbitrary>], iteration_bounds = array<i64: 1, 1>, scalar_prefetch = 0 : i64, scratch_operands = 0 : i64, tpu.core_type = #tpu.core_type<tc>, window_params = [{transform_indices = @transform_0, window_bounds = array<i64: 16, 128>}, {transform_indices = @transform_1, window_bounds = array<i64: 128, 128>}, {transform_indices = @transform_2, window_bounds = array<i64: 128, 128>}, {transform_indices = @transform_3, window_bounds = array<i64: 128, 128>}, {transform_indices = @transform_4, window_bounds = array<i64: 1, 128>}, {transform_indices = @transform_5, window_bounds = array<i64: 1, 128>}, {transform_indices = @transform_6, window_bounds = array<i64: 1, 128>}, {transform_indices = @transform_7, window_bounds = array<i64: 16, 128>}]} {
    %c0_i32 = arith.constant 0 : i32
    %0 = arith.cmpi eq, %arg1, %c0_i32 : i32
    %1 = arith.extui %0 : i1 to i32
    %c0_i32_0 = arith.constant 0 : i32
    %2 = arith.cmpi ne, %1, %c0_i32_0 : i32
    scf.if %2 {
      %cst_16 = arith.constant 0.000000e+00 : f32
      %35 = vector.broadcast %cst_16 : f32 to vector<16x128xf32>
      %c0_17 = arith.constant 0 : index
      %c0_18 = arith.constant 0 : index
      %36 = vector.load %arg9[%c0_17, %c0_18] : memref<16x128xf32, #tpu.memory_space<vmem>>, vector<16x128xf32>
      tpu.vector_store %arg9[%c0_17, %c0_18], %35 {strides = array<i32>} : memref<16x128xf32, #tpu.memory_space<vmem>>, vector<16x128xf32>,
    } else {
    }
    %c0 = arith.constant 0 : index
    %c0_1 = arith.constant 0 : index
    %3 = vector.load %arg3[%c0, %c0_1] : memref<128x128xbf16, #tpu.memory_space<vmem>>, vector<128x128xbf16>
    %4 = arith.extf %3 : vector<128x128xbf16> to vector<128x128xf32>
    %c0_2 = arith.constant 0 : index
    %c0_3 = arith.constant 0 : index
    %5 = vector.load %arg4[%c0_2, %c0_3] : memref<128x128xbf16, #tpu.memory_space<vmem>>, vector<128x128xbf16>
    %6 = arith.extf %5 : vector<128x128xbf16> to vector<128x128xf32>
    %c0_4 = arith.constant 0 : index
    %c0_5 = arith.constant 0 : index
    %7 = vector.load %arg5[%c0_4, %c0_5] : memref<128x128xbf16, #tpu.memory_space<vmem>>, vector<128x128xbf16>
    %8 = arith.extf %7 : vector<128x128xbf16> to vector<128x128xf32>
    %cst = arith.constant 0.000000e+00 : f32
    %9 = vector.broadcast %cst : f32 to vector<128x128xf32>
    %10 = arith.maximumf %6, %9 : vector<128x128xf32>
    %11 = vector.broadcast %cst : f32 to vector<128x128xf32>
    %12 = arith.subf %6, %11 : vector<128x128xf32>
    %13 = arith.cmpf one, %12, %12 : vector<128x128xf32>
    %14 = vector.broadcast %cst : f32 to vector<128x128xf32>
    %15 = arith.addf %6, %14 : vector<128x128xf32>
    %16 = math.absf %12 : vector<128x128xf32>
    %cst_6 = arith.constant 0.000000e+00 : f32
    %17 = vector.broadcast %cst_6 : f32 to vector<128x128xf32>
    %18 = arith.subf %17, %16 : vector<128x128xf32>
    %19 = math.exp %18 : vector<128x128xf32>
    %20 = math.log1p %19 : vector<128x128xf32>
    %21 = arith.addf %10, %20 : vector<128x128xf32>
    %22 = arith.select %13, %15, %21 : vector<128x128xi1>, vector<128x128xf32>
    %23 = arith.mulf %22, %8 : vector<128x128xf32>
    %24 = arith.addf %4, %23 : vector<128x128xf32>
    %25 = arith.truncf %24 : vector<128x128xf32> to vector<128x128xbf16>
    %c0_7 = arith.constant 0 : index
    %c0_8 = arith.constant 0 : index
    %26 = vector.load %arg2[%c0_7, %c0_8] : memref<16x128xf32, #tpu.memory_space<vmem>>, vector<16x128xf32>
    %27 = arith.truncf %26 : vector<16x128xf32> to vector<16x128xbf16>
    %c0_9 = arith.constant 0 : index
    %c0_10 = arith.constant 0 : index
    %28 = vector.load %arg9[%c0_9, %c0_10] : memref<16x128xf32, #tpu.memory_space<vmem>>, vector<16x128xf32>
    %cst_11 = arith.constant dense<0.000000e+00> : vector<16x128xf32>
    %29 = tpu.matmul %27, %25, %cst_11 {dimension_numbers = #tpu.dot_dimension_numbers<[1], [0], [0], [1], [0, 0, 1, 1], [], []>} : vector<16x128xbf16>, vector<128x128xbf16>, vector<16x128xf32> -> vector<16x128xf32>
    %30 = arith.addf %28, %29 : vector<16x128xf32>
    %c0_12 = arith.constant 0 : index
    %c0_13 = arith.constant 0 : index
    %31 = vector.load %arg9[%c0_12, %c0_13] : memref<16x128xf32, #tpu.memory_space<vmem>>, vector<16x128xf32>
    tpu.vector_store %arg9[%c0_12, %c0_13], %30 {strides = array<i32>} : memref<16x128xf32, #tpu.memory_space<vmem>>, vector<16x128xf32>,
    %c0_i32_14 = arith.constant 0 : i32
    %32 = arith.cmpi eq, %arg1, %c0_i32_14 : i32
    %33 = arith.extui %32 : i1 to i32
    %c0_i32_15 = arith.constant 0 : i32
    %34 = arith.cmpi ne, %33, %c0_i32_15 : i32
    scf.if %34 {
      %c0_16 = arith.constant 0 : index
      %c0_17 = arith.constant 0 : index
      %35 = vector.load %arg6[%c0_16, %c0_17] : memref<1x128xf32, #tpu.memory_space<vmem>>, vector<1x128xf32>
      %c0_18 = arith.constant 0 : index
      %c0_19 = arith.constant 0 : index
      %36 = vector.load %arg7[%c0_18, %c0_19] : memref<1x128xf32, #tpu.memory_space<vmem>>, vector<1x128xf32>
      %cst_20 = arith.constant 0.000000e+00 : f32
      %37 = vector.broadcast %cst_20 : f32 to vector<1x128xf32>
      %38 = arith.maximumf %36, %37 : vector<1x128xf32>
      %39 = vector.broadcast %cst_20 : f32 to vector<1x128xf32>
      %40 = arith.subf %36, %39 : vector<1x128xf32>
      %41 = arith.cmpf one, %40, %40 : vector<1x128xf32>
      %42 = vector.broadcast %cst_20 : f32 to vector<1x128xf32>
      %43 = arith.addf %36, %42 : vector<1x128xf32>
      %44 = math.absf %40 : vector<1x128xf32>
      %cst_21 = arith.constant 0.000000e+00 : f32
      %45 = vector.broadcast %cst_21 : f32 to vector<1x128xf32>
      %46 = arith.subf %45, %44 : vector<1x128xf32>
      %47 = math.exp %46 : vector<1x128xf32>
      %48 = math.log1p %47 : vector<1x128xf32>
      %49 = arith.addf %38, %48 : vector<1x128xf32>
      %50 = arith.select %41, %43, %49 : vector<1x128xi1>, vector<1x128xf32>
      %c0_22 = arith.constant 0 : index
      %c0_23 = arith.constant 0 : index
      %51 = vector.load %arg8[%c0_22, %c0_23] : memref<1x128xf32, #tpu.memory_space<vmem>>, vector<1x128xf32>
      %52 = arith.mulf %50, %51 : vector<1x128xf32>
      %53 = arith.addf %35, %52 : vector<1x128xf32>
      %c0_24 = arith.constant 0 : index
      %c0_25 = arith.constant 0 : index
      %54 = vector.load %arg9[%c0_24, %c0_25] : memref<16x128xf32, #tpu.memory_space<vmem>>, vector<16x128xf32>
      %55 = vector.broadcast %53 : vector<1x128xf32> to vector<16x128xf32>
      %56 = arith.addf %54, %55 : vector<16x128xf32>
      %c0_26 = arith.constant 0 : index
      %c0_27 = arith.constant 0 : index
      %57 = vector.load %arg9[%c0_26, %c0_27] : memref<16x128xf32, #tpu.memory_space<vmem>>, vector<16x128xf32>
      tpu.vector_store %arg9[%c0_26, %c0_27], %56 {strides = array<i32>} : memref<16x128xf32, #tpu.memory_space<vmem>>, vector<16x128xf32>,
    } else {
    }
    return
  }
  func.func @transform_0(%arg0: i32, %arg1: i32) -> (i32, i32) {
    %c0_i32 = arith.constant 0 : i32
    %c0_i32_0 = arith.constant 0 : i32
    return %c0_i32, %arg1 : i32, i32
  }
  func.func @transform_1(%arg0: i32, %arg1: i32) -> (i32, i32) {
    %c0_i32 = arith.constant 0 : i32
    return %arg1, %arg0 : i32, i32
  }
  func.func @transform_2(%arg0: i32, %arg1: i32) -> (i32, i32) {
    %c0_i32 = arith.constant 0 : i32
    return %arg1, %arg0 : i32, i32
  }
  func.func @transform_3(%arg0: i32, %arg1: i32) -> (i32, i32) {
    %c0_i32 = arith.constant 0 : i32
    return %arg1, %arg0 : i32, i32
  }
  func.func @transform_4(%arg0: i32, %arg1: i32) -> (i32, i32) {
    %c0_i32 = arith.constant 0 : i32
    %c0_i32_0 = arith.constant 0 : i32
    return %c0_i32, %arg0 : i32, i32
  }
  func.func @transform_5(%arg0: i32, %arg1: i32) -> (i32, i32) {
    %c0_i32 = arith.constant 0 : i32
    %c0_i32_0 = arith.constant 0 : i32
    return %c0_i32, %arg0 : i32, i32
  }
  func.func @transform_6(%arg0: i32, %arg1: i32) -> (i32, i32) {
    %c0_i32 = arith.constant 0 : i32
    %c0_i32_0 = arith.constant 0 : i32
    return %c0_i32, %arg0 : i32, i32
  }
  func.func @transform_7(%arg0: i32, %arg1: i32) -> (i32, i32) {
    %c0_i32 = arith.constant 0 : i32
    %c0_i32_0 = arith.constant 0 : i32
    return %c0_i32, %arg0 : i32, i32
  }
}

</mosaic_0001>

<bundles_post_ra>
// kernel: tpu_custom_call.1
= control target key start
LH: loop header
LB: loop body
LE: loop exit
PB: predicated region body
PF: predicated region fallthrough
CT: control target
= control target key end

     0   :  { %12 = vsyncpa [#allocation3], 0  ;;  %s1453_s0 = inlined_call_operand.hbm [shape: f32[16,128], index: 0, kind: input, shape index: {}]   ;;  %s1454_s1 = inlined_call_operand.hbm [shape: bf16[128,128], index: 1, kind: input, shape index: {}]   ;;  %s1455_s2 = inlined_call_operand.hbm [shape: bf16[128,128], index: 2, kind: input, shape index: {}]   ;;  %s1456_s3 = inlined_call_operand.hbm [shape: bf16[128,128], index: 3, kind: input, shape index: {}]   ;;  %s1457_s4 = inlined_call_operand.vmem [shape: f32[1,128], index: 4, kind: input, shape index: {}]   ;;  %s1458_s5 = inlined_call_operand.vmem [shape: f32[1,128], index: 5, kind: input, shape index: {}]   ;;  %s1459_s6 = inlined_call_operand.vmem [shape: f32[1,128], index: 6, kind: input, shape index: {}]   ;;  %s1460_s7 = inlined_call_operand.hbm [shape: f32[16,128], index: 7, kind: output, shape index: {}]  }
   0x1   :  { %13 = vsyncpa [#allocation6], 0 }
   0x2   :  { %14 = vsyncpa [#allocation9], 0 }
   0x3   :  { %15 = vsyncpa [#allocation4], 0  ;;  %s963_s24 = smov [#allocation5]   ;;  %s845_s28 = scalar_lea.hbm %s1454_s1, 1024 }
   0x4   :  { %s33_s25 = sshll.u32 %s963_s24, 4  ;;  %p846_p0 = scmp.ne.s32.totalorder %s1454_s1, %s845_s28  ;;  %s34_s25 = int_to_ptr.vmem [resolvable:$true] %s33_s25 }
   0x5   :  { %p849_p1 = scmp.lt.u32.totalorder %s845_s28, %s1454_s1 }
   0x7   :  { %p851_p2 = pnand %p849_p1, %p846_p0 }
   0x9   :  { %854 = shalt.err (!%p851_p2)
}
   0xa   :  { %s855_s10 = scalar_lea.vmem %s34_s25, 1024  ;;  %p860_p4 = scmp.lt.s32.totalorder %s34_s25, %s34_s25 }
   0xb   :  { %p856_p3 = scmp.ne.s32.totalorder %s34_s25, %s855_s10  ;;  %p861_p5 = scmp.lt.s32.totalorder %s855_s10, %s855_s10 }
   0xd   :  { %p862_p6 = por %p861_p5, %p860_p4 }
   0xf   :  { %p863_p7 = pnand %p862_p6, %p856_p3 }
  0x11   :  { %866 = shalt.err (!%p863_p7)
}
  0x12   :  { %s964_s11 = smov 64   ;;  %s965_s12 = smov 4  }
  0x13   :  { %39 = dma.hbm_to_vmem [thread:$0]  %s1454_s1, 1024, %s34_s25, [#allocation6], %s964_s11, %s964_s11, %s965_s12  }
  0x14   :  { %s966_s15 = smov [#allocation2]   ;;  %s867_s19 = scalar_lea.hbm %s1453_s0, 256 }
  0x15   :  { %s21_s16 = sshll.u32 %s966_s15, 4  ;;  %p868_p8 = scmp.ne.s32.totalorder %s1453_s0, %s867_s19  ;;  %s22_s16 = int_to_ptr.vmem [resolvable:$true] %s21_s16 }
  0x16   :  { %p871_p9 = scmp.lt.u32.totalorder %s867_s19, %s1453_s0 }
  0x18   :  { %p873_p10 = pnand %p871_p9, %p868_p8 }
  0x1a   :  { %876 = shalt.err (!%p873_p10)
}
  0x1b   :  { %s877_s24 = scalar_lea.vmem %s22_s16, 256  ;;  %p882_p12 = scmp.lt.s32.totalorder %s22_s16, %s22_s16 }
  0x1c   :  { %p878_p11 = scmp.ne.s32.totalorder %s22_s16, %s877_s24  ;;  %p883_p13 = scmp.lt.s32.totalorder %s877_s24, %s877_s24 }
  0x1e   :  { %p884_p0 = por %p883_p13, %p882_p12 }
  0x20   :  { %p885_p1 = pnand %p884_p0, %p878_p11 }
  0x22   :  { %888 = shalt.err (!%p885_p1)
}
  0x23   :  { %s967_s1 = smov 128   ;;  %s968_s25 = smov 8  }
  0x24   :  { %27 = dma.hbm_to_vmem [thread:$0]  %s1453_s0, 256, %s22_s16, [#allocation3], %s967_s1, %s967_s1, %s968_s25  }
  0x25   :  { %s969_s28 = smov [#allocation7]   ;;  %s970_s30 = smov [#allocation8]  }
  0x26   :  { %s45_s29 = sshll.u32 %s969_s28, 4  ;;  %s57_s8 = sshll.u32 %s970_s30, 4  ;;  %s46_s29 = int_to_ptr.vmem [resolvable:$true] %s45_s29  ;;  %s1044_s8 = int_to_ptr.vmem [resolvable:$true] %s57_s8 }
  0x27   :  { %s889_s13 = scalar_lea.hbm %s1455_s2, 1024 }
  0x28   :  { %p890_p2 = scmp.ne.s32.totalorder %s1455_s2, %s889_s13  ;;  %p893_p3 = scmp.lt.u32.totalorder %s889_s13, %s1455_s2 }
  0x2a   :  { %p895_p4 = pnand %p893_p3, %p890_p2 }
  0x2c   :  { %898 = shalt.err (!%p895_p4)
}
  0x2d   :  { %s899_s0 = scalar_lea.vmem %s46_s29, 1024  ;;  %p904_p6 = scmp.lt.s32.totalorder %s46_s29, %s46_s29 }
  0x2e   :  { %p900_p5 = scmp.ne.s32.totalorder %s46_s29, %s899_s0  ;;  %p905_p7 = scmp.lt.s32.totalorder %s899_s0, %s899_s0 }
  0x30   :  { %p906_p8 = por %p905_p7, %p904_p6 }
  0x32   :  { %p907_p9 = pnand %p906_p8, %p900_p5 }
  0x34   :  { %910 = shalt.err (!%p907_p9)
}
  0x35   :  { %51 = dma.hbm_to_vmem [thread:$0]  %s1455_s2, 1024, %s46_s29, [#allocation6], %s964_s11, %s964_s11, %s965_s12  }
  0x36   :  { %s911_s22 = scalar_lea.hbm %s1456_s3, 1024 }
  0x37   :  { %p912_p10 = scmp.ne.s32.totalorder %s1456_s3, %s911_s22  ;;  %p915_p11 = scmp.lt.u32.totalorder %s911_s22, %s1456_s3 }
  0x39   :  { %p917_p12 = pnand %p915_p11, %p912_p10 }
  0x3b   :  { %920 = shalt.err (!%p917_p12)
}
  0x3c   :  { %s921_s28 = scalar_lea.vmem %s1044_s8, 1024  ;;  %p926_p0 = scmp.lt.s32.totalorder %s1044_s8, %s1044_s8 }
  0x3d   :  { %p922_p13 = scmp.ne.s32.totalorder %s1044_s8, %s921_s28  ;;  %p927_p1 = scmp.lt.s32.totalorder %s921_s28, %s921_s28 }
  0x3f   :  { %p928_p2 = por %p927_p1, %p926_p0 }
  0x41   :  { %p929_p3 = pnand %p928_p2, %p922_p13 }
  0x43   :  { %932 = shalt.err (!%p929_p3)
}
  0x44   :  { %63 = dma.hbm_to_vmem [thread:$0]  %s1456_s3, 1024, %s1044_s8, [#allocation9], %s964_s11, %s964_s11, %s965_s12  }
  0x45   :  { %955 = dma.done.wait [#allocation3], 256  }
  0x46   :  { %956 = vsyncadd [#allocation3], 4294967040 }
  0x47   :  { %957 = dma.done.wait [#allocation6], 2048  }
  0x48   :  { %958 = vsyncadd [#allocation6], 4294965248 }
  0x49   :  { %959 = dma.done.wait [#allocation9], 1024  }
  0x4a   :  { %960 = vsyncadd [#allocation9], 4294966272  ;;  %v971_v0 = vmov 0.0   ;;  %vm972_vm0 = vmmov 0   ;;  %v653_v1 = vld [vmem:[#allocation7] sm:$0xff]   ;;  %v723_v4 = vld [vmem:[#allocation7 + $0x8] sm:$0xff]  }
  0x4b   :  { %746 = vmatprep.subr.bf16.mxu0 %v971_v0  ;;  %762 = vmatprep.mubr.msk.bf16.mxu0 %vm972_vm0, %v971_v0  ;;  %v1083_v2 = vunpack.c.l.bf16 %v653_v1  ;;  %v1085_v3 = vunpack.c.h.bf16 %v653_v1  ;;  %v1089_v7 = vunpack.c.l.bf16 %v723_v4  ;;  %v1091_v8 = vunpack.c.h.bf16 %v723_v4  ;;  %v724_v9 = vld [vmem:[#allocation7 + $0x10] sm:$0xff]   ;;  %v725_v20 = vld [vmem:[#allocation7 + $0x18] sm:$0xff]   ;;  %v1099_v21 = vld [vmem:[#allocation5] sm:$0xff]   ;;  %s973_s9 = smov [#allocation10]  }
  0x4c   :  { %v1095_v16 = vunpack.c.l.bf16 %v724_v9  ;;  %v1097_v17 = vunpack.c.h.bf16 %v724_v9  ;;  %v1101_v24 = vld [vmem:[#allocation8] sm:$0xff]   ;;  %v1103_v25 = vld [vmem:[#allocation5 + $0x8] sm:$0xff]   ;;  %v1107_v28 = vunpack.c.l.bf16 %v725_v20  ;;  %v1109_v29 = vunpack.c.h.bf16 %v725_v20  ;;  %v1118_v38 = vld [vmem:[#allocation5 + $0x10] sm:$0xff]   ;;  %s606_s10 = sshll.u32 %s973_s9, 4  ;;  %s607_s10 = int_to_ptr.vmem [resolvable:$true] %s606_s10 }
  0x4d   :  { %v233_v5 = vand.u32 2147483647, %v1083_v2  ;;  %v234_v6 = vand.u32 2147483647, %v1085_v3  ;;  %v235_v12 = vand.u32 2147483647, %v1089_v7  ;;  %v622_v30 = vunpack.c.l.bf16 %v1099_v21  ;;  %p938_p5 = scmp.lt.s32.totalorder %s607_s10, %s607_s10 }
  0x4e   :  { %v236_v13 = vand.u32 2147483647, %v1091_v8  ;;  %v237_v26 = vand.u32 2147483647, %v1095_v16  ;;  %v238_v27 = vand.u32 2147483647, %v1097_v17  ;;  %v623_v34 = vunpack.c.h.bf16 %v1099_v21 }
  0x4f   :  { %v249_v10 = vsub.f32 0.0, %v233_v5  ;;  %v250_v11 = vsub.f32 0.0, %v234_v6  ;;  %v251_v18 = vsub.f32 0.0, %v235_v12  ;;  %v1112_v31 = vld [vmem:[#allocation8 + $0x8] sm:$0xff]   ;;  %v686_v35 = vunpack.c.l.bf16 %v1101_v24  ;;  %v726_v39 = vld [vmem:[#allocation7 + $0x20] sm:$0xff]   ;;  %v1128_v50 = vld [vmem:[#allocation8 + $0x10] sm:$0xff]  }
  0x50   :  { %v252_v19 = vsub.f32 0.0, %v236_v13  ;;  %v253_v32 = vsub.f32 0.0, %v237_v26  ;;  %v254_v33 = vsub.f32 0.0, %v238_v27  ;;  %v687_v36 = vunpack.c.h.bf16 %v1101_v24  ;;  %v1140_v9 = vld [vmem:[#allocation8 + $0x18] sm:$0xff]  }
  0x51   :  { %v265_v14 = vmul.f32 1.442695, %v249_v10  ;;  %v267_v15 = vmul.f32 1.442695, %v250_v11  ;;  %v269_v22 = vmul.f32 1.442695, %v251_v18  ;;  %v626_v37 = vunpack.c.l.bf16 %v1103_v25 }
  0x52   :  { %v271_v23 = vmul.f32 1.442695, %v252_v19  ;;  %v627_v40 = vunpack.c.h.bf16 %v1103_v25  ;;  %v273_v41 = vmul.f32 1.442695, %v253_v32  ;;  %v275_v42 = vmul.f32 1.442695, %v254_v33 }
  0x53   :  { %777 = vpow2.f32 %v265_v14  ;;  %v239_v43 = vand.u32 2147483647, %v1107_v28  ;;  %v185_v44 = vmax.f32 %v1083_v2, 0.0  ;;  %v186_v45 = vmax.f32 %v1085_v3, 0.0 }
  0x54   :  { %779 = vpow2.f32 %v267_v15  ;;  %v690_v46 = vunpack.c.l.bf16 %v1112_v31  ;;  %v240_v47 = vand.u32 2147483647, %v1109_v29  ;;  %v691_v48 = vunpack.c.h.bf16 %v1112_v31 }
  0x55   :  { %781 = vpow2.f32 %v269_v22  ;;  %v255_v51 = vsub.f32 0.0, %v239_v43  ;;  %v1131_v54 = vunpack.c.l.bf16 %v726_v39  ;;  %v187_v56 = vmax.f32 %v1089_v7, 0.0 }
  0x56   :  { %783 = vpow2.f32 %v271_v23  ;;  %v256_v53 = vsub.f32 0.0, %v240_v47  ;;  %v188_v57 = vmax.f32 %v1091_v8, 0.0  ;;  %v1135_v59 = vunpack.c.h.bf16 %v726_v39 }
  0x57   :  { %785 = vpow2.f32 %v273_v41  ;;  %v277_v58 = vmul.f32 1.442695, %v255_v51  ;;  %v694_v62 = vunpack.c.l.bf16 %v1128_v50  ;;  %v189_v1 = vmax.f32 %v1095_v16, 0.0 }
  0x58   :  { %787 = vpow2.f32 %v275_v42  ;;  %v279_v12 = vmul.f32 1.442695, %v256_v53  ;;  %v241_v13 = vand.u32 2147483647, %v1131_v54  ;;  %v242_v19 = vand.u32 2147483647, %v1135_v59 }
  0x59   :  { %789 = vpow2.f32 %v277_v58  ;;  %v190_v22 = vmax.f32 %v1097_v17, 0.0  ;;  %vm201_vm1 = vcmp.ne.f32.partialorder %v1083_v2, %v1083_v2  ;;  %vm202_vm4 = vcmp.ne.f32.partialorder %v1085_v3, %v1085_v3 }
  0x5a   :  { %v257_v42 = vsub.f32 0.0, %v241_v13  ;;  %v258_v53 = vsub.f32 0.0, %v242_v19  ;;  %vm203_vm5 = vcmp.ne.f32.partialorder %v1089_v7, %v1089_v7  ;;  %vm204_vm6 = vcmp.ne.f32.partialorder %v1091_v8, %v1091_v8 }
  0x5b   :  { %vm205_vm10 = vcmp.ne.f32.partialorder %v1095_v16, %v1095_v16  ;;  %vm206_vm12 = vcmp.ne.f32.partialorder %v1097_v17, %v1097_v17  ;;  %vm207_vm13 = vcmp.ne.f32.partialorder %v1107_v28, %v1107_v28  ;;  %vm208_vm0 = vcmp.ne.f32.partialorder %v1109_v29, %v1109_v29 }
  0x5c   :  { %v281_v19 = vmul.f32 1.442695, %v257_v42 }
  0x5d   :  { %v778_v55 = vpop.eup %777 }
  0x5e   :  { %v780_v60 = vpop.eup %779  ;;  %v297_v61 = vadd.f32 1.0, %v778_v55  ;;  %v300_v4 = vmul.f32 -0.5, %v778_v55  ;;  %v303_v11 = vand.u32 2147483647, %v778_v55 }
  0x5f   :  { %v306_v5 = vadd.f32 1.0, %v780_v60  ;;  %v309_v6 = vmul.f32 -0.5, %v780_v60  ;;  %v782_v10 = vpop.eup %781  ;;  %v312_v15 = vand.u32 2147483647, %v780_v60 }
  0x60   :  { %791 = vlog2.f32 %v297_v61  ;;  %v784_v14 = vpop.eup %783  ;;  %v315_v18 = vadd.f32 1.0, %v782_v10  ;;  %v301_v27 = vadd.f32 1.0, %v300_v4  ;;  %v318_v33 = vmul.f32 -0.5, %v782_v10 }
  0x61   :  { %793 = vlog2.f32 %v306_v5  ;;  %v324_v20 = vadd.f32 1.0, %v784_v14  ;;  %v310_v32 = vadd.f32 1.0, %v309_v6  ;;  %v327_v39 = vmul.f32 -0.5, %v784_v14  ;;  %v786_v43 = vpop.eup %785 }
  0x62   :  { %795 = vlog2.f32 %v315_v18  ;;  %vm1150_vm2 = vcmp.lt.f32.partialorder %v303_v11, 0.0004427343  ;;  %vm1154_vm3 = vcmp.lt.f32.partialorder %v312_v15, 0.0004427343  ;;  %v1158_v58 = vpop.eup %787  ;;  %v321_v61 = vand.u32 2147483647, %v782_v10 }
  0x63   :  { %797 = vlog2.f32 %v324_v20  ;;  %v330_v4 = vand.u32 2147483647, %v784_v14  ;;  %v333_v5 = vadd.f32 1.0, %v786_v43  ;;  %v336_v6 = vmul.f32 -0.5, %v786_v43  ;;  %v1165_v41 = vpop.eup %789 }
  0x64   :  { %799 = vpow2.f32 %v279_v12  ;;  %v302_v13 = vmul.f32 %v778_v55, %v301_v27  ;;  %v311_v11 = vmul.f32 %v780_v60, %v310_v32  ;;  %v319_v18 = vadd.f32 1.0, %v318_v33 }
  0x65   :  { %v342_v20 = vadd.f32 1.0, %v1158_v58  ;;  %v328_v15 = vadd.f32 1.0, %v327_v39  ;;  %801 = vlog2.f32 %v333_v5  ;;  %v339_v12 = vand.u32 2147483647, %v786_v43 }
  0x66   :  { %v345_v23 = vmul.f32 -0.5, %v1158_v58  ;;  %v348_v55 = vand.u32 2147483647, %v1158_v58  ;;  %v283_v60 = vmul.f32 1.442695, %v258_v53  ;;  %v337_v39 = vadd.f32 1.0, %v336_v6 }
  0x67   :  { %803 = vlog2.f32 %v342_v20  ;;  %vm1171_vm7 = vcmp.lt.f32.partialorder %v321_v61, 0.0004427343  ;;  %vm1175_vm8 = vcmp.lt.f32.partialorder %v330_v4, 0.0004427343  ;;  %v351_v42 = vadd.f32 1.0, %v1165_v41 }
  0x68   :  { %v320_v20 = vmul.f32 %v782_v10, %v319_v18  ;;  %v354_v49 = vmul.f32 -0.5, %v1165_v41  ;;  %805 = vpow2.f32 %v281_v19  ;;  %v329_v53 = vmul.f32 %v784_v14, %v328_v15 }
  0x69   :  { %vm1181_vm9 = vcmp.lt.f32.partialorder %v339_v12, 0.0004427343  ;;  %807 = vlog2.f32 %v351_v42  ;;  %v346_v6 = vadd.f32 1.0, %v345_v23  ;;  %vm1189_vm11 = vcmp.lt.f32.partialorder %v348_v55, 0.0004427343 }
  0x6a   :  { %v792_v27 = vpop.eup %791  ;;  %809 = vpow2.f32 %v283_v60  ;;  %v355_v19 = vadd.f32 1.0, %v354_v49  ;;  %v357_v55 = vand.u32 2147483647, %v1165_v41 }
  0x6b   :  { %v794_v5 = vpop.eup %793  ;;  %v299_v52 = vmul.f32 0.6931472, %v792_v27 }
  0x6c   :  { %v308_v26 = vmul.f32 0.6931472, %v794_v5  ;;  %v796_v4 = vpop.eup %795  ;;  %vm1235_vm14 = vcmp.lt.f32.partialorder %v357_v55, 0.0004427343  ;;  %v356_v21 = vmul.f32 %v1165_v41, %v355_v19  ;;  %v727_v5 = vld [vmem:[#allocation7 + $0x28] sm:$0xff]   ;;  %v1477_v19 = vunpack.c.l.bf16 %v1118_v38 }
  0x6d   :  { %v305_v63 = vsel %vm1150_vm2, %v302_v13, %v299_v52  ;;  %v798_v18 = vpop.eup %797  ;;  %v317_v12 = vmul.f32 0.6931472, %v796_v4  ;;  %v338_v52 = vmul.f32 %v786_v43, %v337_v39 }
  0x6e   :  { %v314_v14 = vsel %vm1154_vm3, %v311_v11, %v308_v26  ;;  %v441_v15 = vadd.f32 %v305_v63, %v185_v44  ;;  %v1199_v47 = vpop.eup %799  ;;  %v326_v13 = vmul.f32 0.6931472, %v798_v18  ;;  %v1273_v18 = vunpack.c.l.bf16 %v727_v5 }
  0x6f   :  { %v442_v23 = vadd.f32 %v314_v14, %v186_v45  ;;  %v323_v44 = vsel %vm1171_vm7, %v320_v20, %v317_v12  ;;  %v360_v63 = vadd.f32 1.0, %v1199_v47  ;;  %v363_v43 = vmul.f32 -0.5, %v1199_v47  ;;  %v802_v11 = vpop.eup %801  ;;  %v718_v12 = vld [vmem:[#allocation5 + $0x18] sm:$0xff]  }
  0x70   :  { %v457_v26 = vsel %vm201_vm1, %v1083_v2, %v441_v15  ;;  %v332_v51 = vsel %vm1175_vm8, %v329_v53, %v326_v13  ;;  %v443_v2 = vadd.f32 %v323_v44, %v187_v56  ;;  %v335_v33 = vmul.f32 0.6931472, %v802_v11 }
  0x71   :  { %v458_v45 = vsel %vm202_vm4, %v1085_v3, %v442_v23  ;;  %v473_v49 = vmul.f32 %v686_v35, %v457_v26  ;;  %v444_v27 = vadd.f32 %v332_v51, %v188_v57  ;;  %v347_v3 = vmul.f32 %v1158_v58, %v346_v6  ;;  %v804_v35 = vpop.eup %803  ;;  %v1293_v26 = vld [vmem:[#allocation5 + $0x20] sm:$0xff]  }
  0x72   :  { %v474_v60 = vmul.f32 %v687_v36, %v458_v45  ;;  %811 = vlog2.f32 %v360_v63  ;;  %v459_v56 = vsel %vm203_vm5, %v1089_v7, %v443_v2  ;;  %v344_v57 = vmul.f32 0.6931472, %v804_v35  ;;  %v1247_v58 = vpop.eup %805  ;;  %v728_v35 = vld [vmem:[#allocation7 + $0x30] sm:$0xff]  }
  0x73   :  { %v489_v32 = vadd.f32 %v622_v30, %v473_v49  ;;  %v460_v36 = vsel %vm204_vm6, %v1091_v8, %v444_v27  ;;  %v475_v30 = vmul.f32 %v690_v46, %v459_v56  ;;  %v341_v42 = vsel %vm1181_vm9, %v338_v52, %v335_v33  ;;  %v808_v20 = vpop.eup %807  ;;  %v733_v27 = vld [vmem:[#allocation8 + $0x20] sm:$0xff]  }
  0x74   :  { %v490_v24 = vadd.f32 %v623_v34, %v474_v60  ;;  %v476_v7 = vmul.f32 %v691_v48, %v460_v36  ;;  %v364_v34 = vadd.f32 1.0, %v363_v43  ;;  %v350_v46 = vsel %vm1189_vm11, %v347_v3, %v344_v57  ;;  %v1260_v31 = vpop.eup %809 }
  0x75   :  { %v491_v8 = vadd.f32 %v626_v37, %v475_v30  ;;  %v445_v4 = vadd.f32 %v341_v42, %v189_v1  ;;  %v446_v41 = vadd.f32 %v350_v46, %v190_v22  ;;  %v353_v61 = vmul.f32 0.6931472, %v808_v20 }
  0x76   :  { %v505_v53 = vpack.c.bf16 %v490_v24, %v489_v32  ;;  %v492_v48 = vadd.f32 %v627_v40, %v476_v7  ;;  %v369_v6 = vadd.f32 1.0, %v1247_v58  ;;  %v366_v10 = vand.u32 2147483647, %v1199_v47 }
  0x77   :  { %v461_v37 = vsel %vm205_vm10, %v1095_v16, %v445_v4  ;;  %v378_v1 = vadd.f32 1.0, %v1260_v31  ;;  %v462_v40 = vsel %vm206_vm12, %v1097_v17, %v446_v41  ;;  %v359_v16 = vsel %vm1235_vm14, %v356_v21, %v353_v61 }
  0x78   :  { %747 = vmatpush3.bf16.msra.mxu0 %v505_v53  ;;  %v506_v25 = vpack.c.bf16 %v492_v48, %v491_v8  ;;  %v477_v22 = vmul.f32 %v694_v62, %v461_v37  ;;  %v1475_v14 = vunpack.c.h.bf16 %v1128_v50  ;;  %v1476_v52 = vmax.f32 %v1107_v28, 0.0 }
  0x79   :  { %748 = vmatprep.subr.bf16.mxu0 %v971_v0  ;;  %813 = vlog2.f32 %v369_v6  ;;  %v1288_v13 = vunpack.c.h.bf16 %v727_v5  ;;  %v365_v17 = vmul.f32 %v1199_v47, %v364_v34  ;;  %v372_v62 = vmul.f32 -0.5, %v1247_v58 }
  0x7a   :  { %v478_v15 = vmul.f32 %v1475_v14, %v462_v40  ;;  %v447_v23 = vadd.f32 %v359_v16, %v1476_v52  ;;  %v493_v55 = vadd.f32 %v1477_v19, %v477_v22  ;;  %815 = vlog2.f32 %v378_v1 }
  0x7b   :  { %v1478_v50 = vunpack.c.h.bf16 %v1118_v38  ;;  %vm1298_vm15 = vcmp.lt.f32.partialorder %v366_v10, 0.0004427343  ;;  %v381_v47 = vmul.f32 -0.5, %v1260_v31  ;;  %v634_v49 = vunpack.c.l.bf16 %v718_v12 }
  0x7c   :  { %v812_v44 = vpop.eup %811  ;;  %749 = vmatpush3.bf16.msra.mxu0 %v506_v25  ;;  %v463_v45 = vsel %vm207_vm13, %v1107_v28, %v447_v23  ;;  %v635_v51 = vunpack.c.h.bf16 %v718_v12  ;;  %v699_v2 = vunpack.c.h.bf16 %v1140_v9  ;;  %v638_v60 = vunpack.c.l.bf16 %v1293_v26 }
  0x7d   :  { %v494_v63 = vadd.f32 %v1478_v50, %v478_v15  ;;  %750 = vmatprep.subr.bf16.mxu0 %v971_v0  ;;  %v362_v11 = vmul.f32 0.6931472, %v812_v44  ;;  %v375_v3 = vand.u32 2147483647, %v1247_v58  ;;  %v1481_v32 = vunpack.c.l.bf16 %v1140_v9 }
  0x7e   :  { %v373_v33 = vadd.f32 1.0, %v372_v62  ;;  %v384_v39 = vand.u32 2147483647, %v1260_v31  ;;  %v1482_v24 = vmax.f32 %v1109_v29, 0.0  ;;  %v382_v30 = vadd.f32 1.0, %v381_v47 }
  0x7f   :  { %v507_v38 = vpack.c.bf16 %v494_v63, %v493_v55  ;;  %v368_v28 = vsel %vm1298_vm15, %v365_v17, %v362_v11  ;;  %v479_v56 = vmul.f32 %v1481_v32, %v463_v45  ;;  %v243_v57 = vand.u32 2147483647, %v1273_v18 }
  0x80   :  { %v448_v36 = vadd.f32 %v368_v28, %v1482_v24  ;;  %v244_v7 = vand.u32 2147483647, %v1288_v13  ;;  %v702_v42 = vunpack.c.l.bf16 %v733_v27  ;;  %v193_v21 = vmax.f32 %v1131_v54, 0.0 }
  0x81   :  { %751 = vmatpush3.bf16.msra.mxu0 %v507_v38  ;;  %v1324_v34 = vunpack.c.l.bf16 %v728_v35  ;;  %v1326_v9 = vunpack.c.h.bf16 %v728_v35  ;;  %v194_v20 = vmax.f32 %v1135_v59, 0.0  ;;  %v259_v53 = vsub.f32 0.0, %v243_v57 }
  0x82   :  { %752 = vmatprep.subr.bf16.mxu0 %v971_v0  ;;  %v464_v5 = vsel %vm208_vm0, %v1109_v29, %v448_v36  ;;  %v260_v8 = vsub.f32 0.0, %v244_v7  ;;  %v495_v4 = vadd.f32 %v634_v49, %v479_v56  ;;  %v374_v48 = vmul.f32 %v1247_v58, %v373_v33  ;;  %v1369_v7 = vld [vmem:[#allocation5 + $0x28] sm:$0xff]  }
  0x83   :  { %v480_v46 = vmul.f32 %v699_v2, %v464_v5  ;;  %vm1334_vm1 = vcmp.lt.f32.partialorder %v375_v3, 0.0004427343  ;;  %v814_v61 = vpop.eup %813  ;;  %v383_v6 = vmul.f32 %v1260_v31, %v382_v30  ;;  %vm1339_vm2 = vcmp.lt.f32.partialorder %v384_v39, 0.0004427343  ;;  %v729_v31 = vld [vmem:[#allocation7 + $0x38] sm:$0xff]  }
  0x84   :  { %v285_v29 = vmul.f32 1.442695, %v259_v53  ;;  %v287_v10 = vmul.f32 1.442695, %v260_v8  ;;  %v816_v1 = vpop.eup %815  ;;  %v371_v40 = vmul.f32 0.6931472, %v814_v61  ;;  %v703_v16 = vunpack.c.h.bf16 %v733_v27 }
  0x85   :  { %v496_v25 = vadd.f32 %v635_v51, %v480_v46  ;;  %v245_v22 = vand.u32 2147483647, %v1324_v34  ;;  %v246_v58 = vand.u32 2147483647, %v1326_v9  ;;  %vm209_vm3 = vcmp.ne.f32.partialorder %v1131_v54, %v1131_v54 }
  0x86   :  { %v380_v14 = vmul.f32 0.6931472, %v816_v1  ;;  %817 = vpow2.f32 %v285_v29  ;;  %v377_v12 = vsel %vm1334_vm1, %v374_v48, %v371_v40  ;;  %vm210_vm4 = vcmp.ne.f32.partialorder %v1135_v59, %v1135_v59  ;;  %v735_v1 = vld [vmem:[#allocation8 + $0x30] sm:$0xff]  }
  0x87   :  { %v508_v15 = vpack.c.bf16 %v496_v25, %v495_v4  ;;  %819 = vpow2.f32 %v287_v10  ;;  %v261_v52 = vsub.f32 0.0, %v245_v22  ;;  %v449_v19 = vadd.f32 %v377_v12, %v193_v21  ;;  %v722_v22 = vld [vmem:[#allocation5 + $0x38] sm:$0xff]  }
  0x88   :  { %v386_v23 = vsel %vm1339_vm2, %v383_v6, %v380_v14  ;;  %v262_v55 = vsub.f32 0.0, %v246_v58  ;;  %v1353_v44 = vunpack.c.l.bf16 %v729_v31  ;;  %v1355_v50 = vunpack.c.h.bf16 %v729_v31 }
  0x89   :  { %753 = vmatpush3.bf16.msra.mxu0 %v508_v15  ;;  %v450_v17 = vadd.f32 %v386_v23, %v194_v20  ;;  %v289_v62 = vmul.f32 1.442695, %v261_v52  ;;  %v639_v63 = vunpack.c.h.bf16 %v1293_v26  ;;  %v465_v43 = vsel %vm209_vm3, %v1131_v54, %v449_v19 }
  0x8a   :  { %754 = vmatprep.subr.bf16.mxu0 %v971_v0  ;;  %v291_v45 = vmul.f32 1.442695, %v262_v55  ;;  %v481_v49 = vmul.f32 %v702_v42, %v465_v43  ;;  %v247_v11 = vand.u32 2147483647, %v1353_v44  ;;  %v248_v38 = vand.u32 2147483647, %v1355_v50 }
  0x8b   :  { %v466_v47 = vsel %vm210_vm4, %v1135_v59, %v450_v17  ;;  %821 = vpow2.f32 %v289_v62  ;;  %v734_v42 = vld [vmem:[#allocation8 + $0x28] sm:$0xff]   ;;  %v642_v4 = vunpack.c.l.bf16 %v1369_v7  ;;  %v643_v48 = vunpack.c.h.bf16 %v1369_v7 }
  0x8c   :  { %v482_v51 = vmul.f32 %v703_v16, %v466_v47  ;;  %823 = vpow2.f32 %v291_v45  ;;  %v497_v2 = vadd.f32 %v638_v60, %v481_v49  ;;  %v263_v3 = vsub.f32 0.0, %v247_v11 }
  0x8d   :  { %v264_v35 = vsub.f32 0.0, %v248_v38  ;;  %v706_v41 = vunpack.c.l.bf16 %v734_v42  ;;  %v707_v61 = vunpack.c.h.bf16 %v734_v42  ;;  %v195_v6 = vmax.f32 %v1273_v18, 0.0 }
  0x8e   :  { %v498_v27 = vadd.f32 %v639_v63, %v482_v51  ;;  %v293_v33 = vmul.f32 1.442695, %v263_v3  ;;  %v196_v37 = vmax.f32 %v1288_v13, 0.0  ;;  %vm211_vm7 = vcmp.ne.f32.partialorder %v1273_v18, %v1273_v18 }
  0x8f   :  { %v295_v39 = vmul.f32 1.442695, %v264_v35  ;;  %vm212_vm8 = vcmp.ne.f32.partialorder %v1288_v13, %v1288_v13  ;;  %v710_v19 = vunpack.c.l.bf16 %v735_v1  ;;  %v711_v55 = vunpack.c.h.bf16 %v735_v1 }
  0x90   :  { %v818_v28 = vpop.eup %817  ;;  %v509_v32 = vpack.c.bf16 %v498_v27, %v497_v2  ;;  %v197_v62 = vmax.f32 %v1324_v34, 0.0  ;;  %v198_v63 = vmax.f32 %v1326_v9, 0.0  ;;  %vm213_vm11 = vcmp.ne.f32.partialorder %v1324_v34, %v1324_v34  ;;  %v514_v2 = vld [vmem:[#allocation2 + $0x8] sm:$0xff] }
  0x91   :  { %v820_v54 = vpop.eup %819  ;;  %v387_v56 = vadd.f32 1.0, %v818_v28  ;;  %v390_v26 = vmul.f32 -0.5, %v818_v28  ;;  %v393_v5 = vand.u32 2147483647, %v818_v28  ;;  %vm214_vm12 = vcmp.ne.f32.partialorder %v1326_v9, %v1326_v9 }
  0x92   :  { %755 = vmatpush3.bf16.msra.mxu0 %v509_v32  ;;  %v396_v59 = vadd.f32 1.0, %v820_v54  ;;  %v399_v24 = vmul.f32 -0.5, %v820_v54  ;;  %v402_v53 = vand.u32 2147483647, %v820_v54  ;;  %vm215_vm14 = vcmp.ne.f32.partialorder %v1353_v44, %v1353_v44 }
  0x93   :  { %756 = vmatprep.subr.bf16.mxu0 %v971_v0  ;;  %825 = vlog2.f32 %v387_v56  ;;  %v391_v21 = vadd.f32 1.0, %v390_v26  ;;  %vm1375_vm5 = vcmp.lt.f32.partialorder %v393_v5, 0.0004427343  ;;  %vm216_vm0 = vcmp.ne.f32.partialorder %v1355_v50, %v1355_v50 }
  0x94   :  { %827 = vlog2.f32 %v396_v59  ;;  %v400_v20 = vadd.f32 1.0, %v399_v24  ;;  %vm1379_vm6 = vcmp.lt.f32.partialorder %v402_v53, 0.0004427343 }
  0x95   :  { %v822_v60 = vpop.eup %821  ;;  %829 = vpow2.f32 %v293_v33  ;;  %v392_v29 = vmul.f32 %v818_v28, %v391_v21 }
  0x96   :  { %v824_v36 = vpop.eup %823  ;;  %v405_v30 = vadd.f32 1.0, %v822_v60  ;;  %831 = vpow2.f32 %v295_v39  ;;  %v408_v8 = vmul.f32 -0.5, %v822_v60  ;;  %v401_v40 = vmul.f32 %v820_v54, %v400_v20  ;;  %v721_v39 = vld [vmem:[#allocation5 + $0x30] sm:$0xff]  }
  0x97   :  { %v414_v57 = vadd.f32 1.0, %v824_v36  ;;  %v417_v46 = vmul.f32 -0.5, %v824_v36  ;;  %v411_v16 = vand.u32 2147483647, %v822_v60  ;;  %v420_v12 = vand.u32 2147483647, %v824_v36 }
  0x98   :  { %833 = vlog2.f32 %v405_v30  ;;  %v409_v58 = vadd.f32 1.0, %v408_v8  ;;  %v646_v7 = vunpack.c.l.bf16 %v721_v39  ;;  %v647_v5 = vunpack.c.h.bf16 %v721_v39 }
  0x99   :  { %835 = vlog2.f32 %v414_v57  ;;  %v418_v15 = vadd.f32 1.0, %v417_v46  ;;  %vm1393_vm9 = vcmp.lt.f32.partialorder %v411_v16, 0.0004427343  ;;  %vm1397_vm10 = vcmp.lt.f32.partialorder %v420_v12, 0.0004427343 }
  0x9a   :  { %v410_v51 = vmul.f32 %v822_v60, %v409_v58 }
  0x9b   :  { %v419_v27 = vmul.f32 %v824_v36, %v418_v15 }
  0x9d   :  { %v826_v25 = vpop.eup %825 }
  0x9e   :  { %v828_v14 = vpop.eup %827  ;;  %v389_v31 = vmul.f32 0.6931472, %v826_v25  ;;  %v199_v25 = vmax.f32 %v1353_v44, 0.0 }
  0x9f   :  { %v830_v52 = vpop.eup %829  ;;  %v398_v23 = vmul.f32 0.6931472, %v828_v14  ;;  %v200_v14 = vmax.f32 %v1355_v50, 0.0 }
  0xa0   :  { %v395_v17 = vsel %vm1375_vm5, %v392_v29, %v389_v31  ;;  %v423_v43 = vadd.f32 1.0, %v830_v52  ;;  %v832_v45 = vpop.eup %831  ;;  %v426_v54 = vmul.f32 -0.5, %v830_v52  ;;  %v429_v53 = vand.u32 2147483647, %v830_v52 }
  0xa1   :  { %v404_v47 = vsel %vm1379_vm6, %v401_v40, %v398_v23  ;;  %v451_v49 = vadd.f32 %v395_v17, %v195_v6  ;;  %v432_v56 = vadd.f32 1.0, %v832_v45  ;;  %v438_v10 = vand.u32 2147483647, %v832_v45 }
  0xa2   :  { %v834_v11 = vpop.eup %833  ;;  %v452_v38 = vadd.f32 %v404_v47, %v196_v37  ;;  %837 = vlog2.f32 %v423_v43  ;;  %v427_v21 = vadd.f32 1.0, %v426_v54  ;;  %v736_v37 = vld [vmem:[#allocation8 + $0x38] sm:$0xff]   ;;  %vm430_vm13 = vcmp.lt.f32.partialorder %v429_v53, 0.0004427343 }
  0xa3   :  { %v836_v35 = vpop.eup %835  ;;  %v467_v28 = vsel %vm211_vm7, %v1273_v18, %v451_v49  ;;  %v407_v32 = vmul.f32 0.6931472, %v834_v11  ;;  %839 = vlog2.f32 %v432_v56  ;;  %v714_v58 = vunpack.c.l.bf16 %v736_v37 }
  0xa4   :  { %v468_v33 = vsel %vm212_vm8, %v1288_v13, %v452_v38  ;;  %v483_v59 = vmul.f32 %v706_v41, %v467_v28  ;;  %v416_v26 = vmul.f32 0.6931472, %v836_v35  ;;  %v435_v13 = vmul.f32 -0.5, %v832_v45  ;;  %v567_v38 = vld [vmem:[%s1458_s5] sm:$0x1] }
  0xa5   :  { %v484_v60 = vmul.f32 %v707_v61, %v468_v33  ;;  %v413_v18 = vsel %vm1393_vm9, %v410_v51, %v407_v32  ;;  %v428_v29 = vmul.f32 %v830_v52, %v427_v21  ;;  %vm439_vm15 = vcmp.lt.f32.partialorder %v438_v10, 0.0004427343  ;;  %v513_v51 = vld [vmem:[#allocation2] sm:$0xff] }
  0xa6   :  { %v499_v24 = vadd.f32 %v642_v4, %v483_v59  ;;  %v422_v36 = vsel %vm1397_vm10, %v419_v27, %v416_v26  ;;  %v453_v30 = vadd.f32 %v413_v18, %v197_v62  ;;  %v436_v6 = vadd.f32 1.0, %v435_v13 }
  0xa7   :  { %v500_v57 = vadd.f32 %v643_v48, %v484_v60  ;;  %v454_v42 = vadd.f32 %v422_v36, %v198_v63  ;;  %v650_v52 = vunpack.c.l.bf16 %v722_v22  ;;  %v715_v23 = vunpack.c.h.bf16 %v736_v37  ;;  %v586_v36 = vld [vmem:[%s1459_s6] sm:$0x1]  ;;  %s933_s6 = scalar_lea.vmem %s607_s10, 256 }
  0xa8   :  { %v469_v20 = vsel %vm213_vm11, %v1324_v34, %v453_v30  ;;  %v651_v63 = vunpack.c.h.bf16 %v722_v22  ;;  %v571_v27 = vand.u32 2147483647, %v567_v38  ;;  %v568_v39 = vmax.f32 %v567_v38, 0.0  ;;  %p934_p4 = scmp.ne.s32.totalorder %s607_s10, %s933_s6  ;;  %p939_p6 = scmp.lt.s32.totalorder %s933_s6, %s933_s6 }
  0xa9   :  { %v510_v8 = vpack.c.bf16 %v500_v57, %v499_v24  ;;  %v470_v46 = vsel %vm214_vm12, %v1326_v9, %v454_v42  ;;  %v485_v41 = vmul.f32 %v710_v19, %v469_v20  ;;  %v437_v9 = vmul.f32 %v832_v45, %v436_v6  ;;  %v566_v57 = vld [vmem:[%s1457_s4] sm:$0x1] }
  0xaa   :  { %v486_v61 = vmul.f32 %v711_v55, %v470_v46  ;;  %vm569_vm2 = vcmp.ne.f32.partialorder %v567_v38, %v567_v38  ;;  %v592_v18 = vlaneseq  ;;  %p940_p7 = por %p939_p6, %p938_p5 }
  0xab   :  { %757 = vmatpush3.bf16.msra.mxu0 %v510_v8  ;;  %v501_v4 = vadd.f32 %v646_v7, %v485_v41 }
  0xac   :  { %v838_v1 = vpop.eup %837  ;;  %758 = vmatprep.subr.bf16.mxu0 %v971_v0  ;;  %v502_v48 = vadd.f32 %v647_v5, %v486_v61  ;;  %v593_v13 = vshrl.u32 %v592_v18, 7  ;;  %p941_p8 = pnand %p940_p7, %p934_p4 }
  0xad   :  { %v425_v34 = vmul.f32 0.6931472, %v838_v1  ;;  %v840_v16 = vpop.eup %839 }
  0xae   :  { %v511_v40 = vpack.c.bf16 %v502_v48, %v501_v4  ;;  %v434_v15 = vmul.f32 0.6931472, %v840_v16  ;;  %v594_v42 = vsub.s32 0, %v593_v13 }
  0xaf   :  { %v431_v31 = vsel %vm430_vm13, %v428_v29, %v425_v34 }
  0xb0   :  { %759 = vmatpush3.bf16.msra.mxu0 %v511_v40  ;;  %v455_v12 = vadd.f32 %v431_v31, %v199_v25  ;;  %v440_v19 = vsel %vm439_vm15, %v437_v9, %v434_v15 }
  0xb1   :  { %760 = vmatprep.subr.bf16.mxu0 %v971_v0  ;;  %v456_v17 = vadd.f32 %v440_v19, %v200_v14  ;;  %v515_v0 = vpack.c.bf16 %v514_v2, %v513_v51 }
  0xb2   :  { %v471_v55 = vsel %vm215_vm14, %v1353_v44, %v455_v12  ;;  %v572_v44 = vsub.f32 0.0, %v571_v27 }
  0xb3   :  { %v487_v62 = vmul.f32 %v714_v58, %v471_v55  ;;  %v472_v43 = vsel %vm216_vm0, %v1355_v50, %v456_v17 }
  0xb4   :  { %v488_v45 = vmul.f32 %v715_v23, %v472_v43  ;;  %v573_v3 = vmul.f32 1.442695, %v572_v44 }
  0xb5   :  { %v503_v47 = vadd.f32 %v650_v52, %v487_v62 }
  0xb6   :  { %v504_v49 = vadd.f32 %v651_v63, %v488_v45  ;;  %841 = vpow2.f32 %v573_v3 }
  0xb8   :  { %v512_v11 = vpack.c.bf16 %v504_v49, %v503_v47 }
  0xba   :  { %761 = vmatpush3.bf16.msra.mxu0 %v512_v11 }
  0xbd   :  { %763 = vmatmul.mubr.bf16.vlgmr.msra.gmra.mrb[0].mxu0 %v515_v0 }
  0xc0   :  { %v842_v35 = vpop.eup %841 }
  0xc1   :  { %v575_v28 = vadd.f32 1.0, %v842_v35  ;;  %v578_v50 = vmul.f32 -0.5, %v842_v35  ;;  %v581_v56 = vand.u32 2147483647, %v842_v35 }
  0xc3   :  { %843 = vlog2.f32 %v575_v28  ;;  %v579_v32 = vadd.f32 1.0, %v578_v50  ;;  %vm582_vm1 = vcmp.lt.f32.partialorder %v581_v56, 0.0004427343 }
  0xc5   :  { %v580_v59 = vmul.f32 %v842_v35, %v579_v32 }
  0xcd   :  { %v844_v54 = vpop.eup %843 }
  0xce   :  { %v577_v33 = vmul.f32 0.6931472, %v844_v54 }
  0xd0   :  { %v583_v26 = vsel %vm582_vm1, %v580_v59, %v577_v33 }
  0xd1   :  { %v584_v60 = vadd.f32 %v583_v26, %v568_v39 }
  0xd3   :  { %v585_v24 = vsel %vm569_vm2, %v567_v38, %v584_v60 }
  0xd4   :  { %v587_v30 = vmul.f32 %v586_v36, %v585_v24 }
  0xd6   :  { %v588_v7 = vadd.f32 %v587_v30, %v566_v57 }
  0xd8   :  { %v595_v21 = vrot.slane %v588_v7, %v594_v42 }
 0x190   :  { %v552_v5 = vpop.f32.mrb[0].mxu0 }
 0x191   :  { %v764_v20 = vpop.f32.mrb[1].mxu0  ;;  %v597_v46 = vadd.f32 %v595_v21, %v552_v5 }
 0x192   :  { %v555_v53 = vpop.f32.mrb[2].mxu0 }
 0x193   :  { %v765_v8 = vpop.f32.mrb[3].mxu0  ;;  %v598_v41 = vadd.f32 %v595_v21, %v555_v53  ;;  %599 = vst [vmem:[#allocation10] sm:$0xff] %v597_v46 }
 0x195   :  { %600 = vst [vmem:[#allocation10 + $0x8] sm:$0xff] %v598_v41 }
 0x196   :  { %944 = shalt.err (!%p941_p8)
}
 0x197   :  { %s945_s14 = scalar_lea.hbm %s1460_s7, 256 }
 0x198   :  { %p946_p9 = scmp.ne.s32.totalorder %s1460_s7, %s945_s14  ;;  %p949_p10 = scmp.lt.u32.totalorder %s945_s14, %s1460_s7 }
 0x19a   :  { %p951_p11 = pnand %p949_p10, %p946_p9 }
 0x19c   :  { %954 = shalt.err (!%p951_p11)
}
 0x19d   :  { %612 = dma.vmem_to_hbm [thread:$0]  %s607_s10, 256, %s1460_s7, [#allocation4], %s967_s1, %s967_s1, %s968_s25  }
 0x19e   :  { %961 = dma.done.wait [#allocation4], 256  }
 0x19f   :  { %962 = vsyncadd [#allocation4], 4294967040 }
 0x1a0   :  { %616 = vsyncpa [#allocation3], 1 }
 0x1a1   :  { %617 = vsyncpa [#allocation6], 1 }
 0x1a2   :  { %618 = vsyncpa [#allocation9], 1 }
 0x1a3   :  { %619 = vsyncpa [#allocation4], 1 }

</bundles_post_ra>
